<compile_context>
chip_gen: v5e
topology: v5e:2x2
jax: 0.10.0
libtpu: 0.0.40
codegen_flags: <defaults>
</compile_context>

<pallas_src>
import functools

import numpy as np
import jax
import jax.numpy as jnp
from jax import lax
from jax.experimental import pallas as pl
from jax.experimental.pallas import tpu as pltpu

LANE = 128
_VMEM_LIMIT = 32 * 1024 * 1024   # safe on v5e/v6e/v7x; footprint here is <1 MiB


def _round_up(v, m):
    return (v + m - 1) // m * m


# ---------------------------------------------------------------------------
# Fused forward kernel.
# grid = (B,): one image per grid step ("parallel" -> one image per TensorCore
# on v7x).  All matmuls are bf16 x bf16 -> f32 on the MXU; activations never
# leave VMEM/vregs until the two final stores.
# ---------------------------------------------------------------------------
def _fused_forward_kernel(cols0_ref, ws_ref, bs_ref, w1_ref, b1_ref,
                          w2_ref, b2_ref, w3_ref, b3_ref, wd_ref, bd_ref,
                          sel_ref, local_ref, glob_ref, *, n_taps, inv_hw):
    f32 = jnp.float32
    bf16 = jnp.bfloat16

    # --- stem: 3x3 stride-2 conv (pre-gathered patch columns) + bias + ReLU --
    y0 = jnp.dot(cols0_ref[0], ws_ref[...], preferred_element_type=f32)
    y0 = jnp.maximum(y0 + bs_ref[...], 0.0)               # (HW0, Cstem) f32
    y0 = y0.astype(bf16)

    # --- projection shortcut: 1x1 stride-2 conv.
    #     The stride-2 spatial subsample is exactly the center-tap selector
    #     (offset (0,0)), so sel[n_taps//2] @ y0 gathers the even positions.
    #     Selection weights are 0/1, so the bf16 matmul is an exact gather.
    y0_ds = jnp.dot(sel_ref[n_taps // 2], y0,
                    preferred_element_type=f32).astype(bf16)      # (HW1, Cstem)
    identity = jnp.dot(y0_ds, wd_ref[...],
                       preferred_element_type=f32) + bd_ref[...]  # (HW1, Cemb) f32

    # --- main path: 1x1 conv + ReLU ------------------------------------------
    y1 = jnp.dot(y0, w1_ref[...], preferred_element_type=f32)
    y1 = jnp.maximum(y1 + b1_ref[...], 0.0).astype(bf16)          # (HW0, Cmid)

    # --- 3x3 stride-2 conv, in-kernel tap loop (no im2col / HBM round trip):
    #     acc += (S_t @ y1) @ W2_t, where S_t is the 0/1 shift+stride selector
    #     for tap t (all-zero rows implement the zero padding).
    acc = None
    for t in range(n_taps):
        shifted = jnp.dot(sel_ref[t], y1,
                          preferred_element_type=f32).astype(bf16)  # exact gather
        term = jnp.dot(shifted, w2_ref[t], preferred_element_type=f32)
        acc = term if acc is None else acc + term
    y2 = jnp.maximum(acc + b2_ref[...], 0.0).astype(bf16)          # (HW1, Cmid)

    # --- 1x1 conv + residual add (f32) + ReLU, fused epilogue -----------------
    y3 = jnp.dot(y2, w3_ref[...], preferred_element_type=f32) + b3_ref[...] + identity
    y3 = jnp.maximum(y3, 0.0)                                      # (HW1, Cemb) f32

    local_ref[0] = y3.astype(local_ref.dtype)
    # --- fused global average pool (AdaptiveAvgPool2d((1,1))) -----------------
    glob_ref[0] = (jnp.sum(y3, axis=0, keepdims=True) * inv_hw).astype(glob_ref.dtype)


# ---------------------------------------------------------------------------
# Host-side helpers
# ---------------------------------------------------------------------------
@functools.lru_cache(maxsize=None)
def _tap_selectors(h_in, w_in, stride, pad, ksize):
    """0/1 selection matrices S[t] : (HWout, HWin) with
    S[t][ho*Wout+wo, hi*Win+wi] = 1 where (hi, wi) = (ho*stride + i - pad,
    wo*stride + j - pad) for tap t = i*ksize + j (zero row when out of bounds).
    The center tap (i = j = pad) is exactly the 1x1 stride-`stride` sampler."""
    h_out = (h_in + 2 * pad - ksize) // stride + 1
    w_out = (w_in + 2 * pad - ksize) // stride + 1
    sel = np.zeros((ksize * ksize, h_out * w_out, h_in * w_in), np.float32)
    for i in range(ksize):
        for j in range(ksize):
            t = i * ksize + j
            for ho in range(h_out):
                for wo in range(w_out):
                    hi = ho * stride + i - pad
                    wi = wo * stride + j - pad
                    if 0 <= hi < h_in and 0 <= wi < w_in:
                        sel[t, ho * w_out + wo, hi * w_in + wi] = 1.0
    return jnp.asarray(sel, jnp.bfloat16)


def _stem_cols(x_nhwc, ksize, stride, pad, k_pad):
    """Stride-2 im2col of the raw input (XLA glue; see TODO in header)."""
    B, H, W, C = x_nhwc.shape
    xp = jnp.pad(x_nhwc, ((0, 0), (pad, pad), (pad, pad), (0, 0)))
    Ho = (H + 2 * pad - ksize) // stride + 1
    Wo = (W + 2 * pad - ksize) // stride + 1
    taps = []
    for i in range(ksize):
        for j in range(ksize):
            taps.append(xp[:, i:i + Ho * stride:stride, j:j + Wo * stride:stride, :])
    cols = jnp.concatenate(taps, axis=-1).reshape(B, Ho * Wo, ksize * ksize * C)
    cols = jnp.pad(cols, ((0, 0), (0, 0), (0, k_pad - ksize * ksize * C)))
    return cols.astype(jnp.bfloat16), Ho, Wo


# ---------------------------------------------------------------------------
# Forward
# ---------------------------------------------------------------------------
def resnet_forward(x_nchw, params, region_num, v_embedding):
    # NCHW (PyTorch) -> NHWC (kernel layout)
    x = jnp.transpose(x_nchw, (0, 2, 3, 1)).astype(jnp.bfloat16)
    B = x.shape[0]

    k_pad, c_stem = params["stem_w"].shape
    c_mid = params["w1"].shape[1]
    c_emb = params["w3"].shape[1]

    cols0, H0, W0 = _stem_cols(x, 3, 2, 1, k_pad)            # (B, HW0, Kp) bf16
    HW0 = H0 * W0

    sel = _tap_selectors(H0, W0, 2, 1, 3)                    # (9, HW1, HW0) bf16
    n_taps, HW1, _ = sel.shape
    assert HW1 == region_num and c_emb == v_embedding
    assert HW0 % 8 == 0 and HW1 % 8 == 0                     # sublane alignment

    flops = B * (
        2 * HW0 * k_pad * c_stem                             # stem
        + 2 * HW0 * c_stem * c_mid                           # w1
        + 2 * HW1 * HW0 * c_stem + 2 * HW1 * c_stem * c_emb  # shortcut
        + n_taps * (2 * HW1 * HW0 * c_mid + 2 * HW1 * c_mid * c_mid)  # w2 taps
        + 2 * HW1 * c_mid * c_emb                            # w3
    )
    weight_args = (params["stem_w"], params["stem_b"], params["w1"], params["b1"],
                   params["w2"], params["b2"], params["w3"], params["b3"],
                   params["wd"], params["bd"], sel)
    bytes_accessed = int(
        cols0.size * cols0.dtype.itemsize
        + sum(int(a.size) * a.dtype.itemsize for a in weight_args)
        + B * HW1 * c_emb * 4 + B * c_emb * 4
    )

    kernel = functools.partial(_fused_forward_kernel,
                               n_taps=int(n_taps), inv_hw=1.0 / HW1)

    local, glob = pl.pallas_call(
        kernel,
        out_shape=(jax.ShapeDtypeStruct((B, HW1, c_emb), jnp.float32),
                   jax.ShapeDtypeStruct((B, 1, c_emb), jnp.float32)),
        grid_spec=pltpu.PrefetchScalarGridSpec(
            num_scalar_prefetch=0,
            grid=(B,),
            in_specs=[
                pl.BlockSpec((1, HW0, k_pad), lambda b: (b, 0, 0)),       # cols0
                pl.BlockSpec((k_pad, c_stem), lambda b: (0, 0)),          # stem_w
                pl.BlockSpec((1, c_stem), lambda b: (0, 0)),              # stem_b
                pl.BlockSpec((c_stem, c_mid), lambda b: (0, 0)),          # w1
                pl.BlockSpec((1, c_mid), lambda b: (0, 0)),               # b1
                pl.BlockSpec((n_taps, c_mid, c_mid), lambda b: (0, 0, 0)),  # w2
                pl.BlockSpec((1, c_mid), lambda b: (0, 0)),               # b2
                pl.BlockSpec((c_mid, c_emb), lambda b: (0, 0)),           # w3
                pl.BlockSpec((1, c_emb), lambda b: (0, 0)),               # b3
                pl.BlockSpec((c_stem, c_emb), lambda b: (0, 0)),          # wd
                pl.BlockSpec((1, c_emb), lambda b: (0, 0)),               # bd
                pl.BlockSpec((n_taps, HW1, HW0), lambda b: (0, 0, 0)),    # sel
            ],
            out_specs=[
                pl.BlockSpec((1, HW1, c_emb), lambda b: (b, 0, 0)),       # local
                pl.BlockSpec((1, 1, c_emb), lambda b: (b, 0, 0)),         # global
            ],
        ),
        compiler_params=pltpu.CompilerParams(
            dimension_semantics=("parallel",),
            vmem_limit_bytes=_VMEM_LIMIT,
        ),
        cost_estimate=pl.CostEstimate(flops=int(flops), transcendentals=0,
                                      bytes_accessed=bytes_accessed),
    )(cols0, params["stem_w"], params["stem_b"], params["w1"], params["b1"],
      params["w2"], params["b2"], params["w3"], params["b3"],
      params["wd"], params["bd"], sel)

    local_feature = local                       # (B, region_num, v_embedding)
    global_feature = glob.reshape(B, c_emb)     # (B, v_embedding)
    return local_feature, global_feature


# ---------------------------------------------------------------------------
# Deterministic parameter init (BN folded into conv bias); weights pre-padded
# and pre-cast to bf16 ONCE here (no per-forward padding).
# ---------------------------------------------------------------------------
def _he(key, shape, fan_in):
    return jax.random.normal(key, shape, jnp.float32) * np.sqrt(2.0 / fan_in)


def init_params(key, c_in, c_stem, c_mid, v_embedding):
    ks = jax.random.split(key, 10)
    k_stem = 3 * 3 * c_in
    k_stem_pad = _round_up(k_stem, LANE)
    stem_w = _he(ks[0], (k_stem, c_stem), k_stem)
    stem_w = jnp.pad(stem_w, ((0, k_stem_pad - k_stem), (0, 0)))   # zero K rows
    small = 0.1
    return {
        "stem_w": stem_w.astype(jnp.bfloat16),                       # (Kp, c_stem)
        "stem_b": (small * jax.random.normal(ks[1], (1, c_stem))).astype(jnp.float32),
        "w1": _he(ks[2], (c_stem, c_mid), c_stem).astype(jnp.bfloat16),
        "b1": (small * jax.random.normal(ks[3], (1, c_mid))).astype(jnp.float32),
        "w2": _he(ks[4], (9, c_mid, c_mid), 9 * c_mid).astype(jnp.bfloat16),
        "b2": (small * jax.random.normal(ks[5], (1, c_mid))).astype(jnp.float32),
        "w3": _he(ks[6], (c_mid, v_embedding), c_mid).astype(jnp.bfloat16),
        "b3": (small * jax.random.normal(ks[7], (1, v_embedding))).astype(jnp.float32),
        "wd": _he(ks[8], (c_stem, v_embedding), c_stem).astype(jnp.bfloat16),
        "bd": (small * jax.random.normal(ks[9], (1, v_embedding))).astype(jnp.float32),
    }


# ---------------------------------------------------------------------------
# Independent pure-JAX reference (f32 convolutions) for validation.
# ---------------------------------------------------------------------------
def _reference_forward(x_nchw, params, c_in):
    f32 = jnp.float32
    x = jnp.transpose(x_nchw, (0, 2, 3, 1)).astype(f32)

    def conv(inp, w_hwio, b, stride):
        p = w_hwio.shape[0] // 2
        out = lax.conv_general_dilated(
            inp, w_hwio, window_strides=(stride, stride),
            padding=[(p, p), (p, p)],
            dimension_numbers=("NHWC", "HWIO", "NHWC"))
        return out + b.reshape(1, 1, 1, -1).astype(f32)

    ws = params["stem_w"][:9 * c_in].astype(f32).reshape(3, 3, c_in, -1)
    y0 = jax.nn.relu(conv(x, ws, params["stem_b"], 2))
    w1 = params["w1"].astype(f32).reshape(1, 1, *params["w1"].shape)
    wd = params["wd"].astype(f32).reshape(1, 1, *params["wd"].shape)
    w3 = params["w3"].astype(f32).reshape(1, 1, *params["w3"].shape)
    w2 = params["w2"].astype(f32).reshape(3, 3, *params["w2"].shape[1:])
    identity = conv(y0, wd, params["bd"], 2)
    y1 = jax.nn.relu(conv(y0, w1, params["b1"], 1))
    y2 = jax.nn.relu(conv(y1, w2, params["b2"], 2))
    y3 = jax.nn.relu(conv(y2, w3, params["b3"], 1) + identity)
    B, Ho, Wo, C = y3.shape
    local = y3.reshape(B, Ho * Wo, C)
    return local, jnp.mean(local, axis=1)


# ---------------------------------------------------------------------------
if __name__ == "__main__":
    B, C_in, H, W = 2, 3, 16, 16          # small RGB images
    c_stem, c_mid = 64, 64
    v_embedding = 128                      # lane-dense feature channels
    region_num = 16                        # (16/2/2)^2 = 4*4 spatial positions

    key = jax.random.PRNGKey(0)
    k_x, k_p = jax.random.split(key)
    x = jax.random.normal(k_x, (B, C_in, H, W), jnp.float32)
    params = init_params(k_p, C_in, c_stem, c_mid, v_embedding)

    fwd = jax.jit(functools.partial(resnet_forward,
                                    region_num=region_num,
                                    v_embedding=v_embedding))
    local_feature, global_feature = fwd(x, params)
    jax.block_until_ready((local_feature, global_feature))

    assert local_feature.shape == (B, region_num, v_embedding)
    assert global_feature.shape == (B, v_embedding)

    # global feature must equal spatial mean of local feature (same semantics)
    ref_global = jnp.mean(local_feature, axis=1)
    assert jnp.allclose(global_feature, ref_global, atol=1e-4, rtol=1e-4)

    # independent pure-JAX (f32 conv) reference; loose max-norm tolerance
    # covers bf16 MXU operand rounding, catches any spatial/tap logic error.
    ref_local, ref_glob = _reference_forward(x, params, C_in)
    scale_l = float(jnp.max(jnp.abs(ref_local))) + 1e-6
    scale_g = float(jnp.max(jnp.abs(ref_glob))) + 1e-6
    assert float(jnp.max(jnp.abs(local_feature - ref_local))) <= 0.05 * scale_l
    assert float(jnp.max(jnp.abs(global_feature - ref_glob))) <= 0.05 * scale_g

    print("KERNEL_OK")
</pallas_src>

<mosaic_0001>
module attributes {stable_mosaic.version = 11 : i64} {
  func.func @_fused_forward_kernel(%arg0: i32, %arg1: memref<1x64x128xbf16, #tpu.memory_space<vmem>>, %arg2: memref<128x64xbf16, #tpu.memory_space<vmem>>, %arg3: memref<1x64xf32, #tpu.memory_space<vmem>>, %arg4: memref<64x64xbf16, #tpu.memory_space<vmem>>, %arg5: memref<1x64xf32, #tpu.memory_space<vmem>>, %arg6: memref<9x64x64xbf16, #tpu.memory_space<vmem>>, %arg7: memref<1x64xf32, #tpu.memory_space<vmem>>, %arg8: memref<64x128xbf16, #tpu.memory_space<vmem>>, %arg9: memref<1x128xf32, #tpu.memory_space<vmem>>, %arg10: memref<64x128xbf16, #tpu.memory_space<vmem>>, %arg11: memref<1x128xf32, #tpu.memory_space<vmem>>, %arg12: memref<9x16x64xbf16, #tpu.memory_space<vmem>>, %arg13: memref<1x16x128xf32, #tpu.memory_space<vmem>>, %arg14: memref<1x1x128xf32, #tpu.memory_space<vmem>>) attributes {dimension_semantics = [#tpu.dimension_semantics<parallel>], iteration_bounds = array<i64: 2>, scalar_prefetch = 0 : i64, scratch_operands = 0 : i64, tpu.core_type = #tpu.core_type<tc>, window_params = [{transform_indices = @transform_0, window_bounds = array<i64: 1, 64, 128>}, {pipeline_mode = #tpu.pipeline_mode<synchronous>, transform_indices = @transform_1, window_bounds = array<i64: 128, 64>}, {pipeline_mode = #tpu.pipeline_mode<synchronous>, transform_indices = @transform_2, window_bounds = array<i64: 1, 64>}, {pipeline_mode = #tpu.pipeline_mode<synchronous>, transform_indices = @transform_3, window_bounds = array<i64: 64, 64>}, {pipeline_mode = #tpu.pipeline_mode<synchronous>, transform_indices = @transform_4, window_bounds = array<i64: 1, 64>}, {pipeline_mode = #tpu.pipeline_mode<synchronous>, transform_indices = @transform_5, window_bounds = array<i64: 9, 64, 64>}, {pipeline_mode = #tpu.pipeline_mode<synchronous>, transform_indices = @transform_6, window_bounds = array<i64: 1, 64>}, {pipeline_mode = #tpu.pipeline_mode<synchronous>, transform_indices = @transform_7, window_bounds = array<i64: 64, 128>}, {pipeline_mode = #tpu.pipeline_mode<synchronous>, transform_indices = @transform_8, window_bounds = array<i64: 1, 128>}, {pipeline_mode = #tpu.pipeline_mode<synchronous>, transform_indices = @transform_9, window_bounds = array<i64: 64, 128>}, {pipeline_mode = #tpu.pipeline_mode<synchronous>, transform_indices = @transform_10, window_bounds = array<i64: 1, 128>}, {pipeline_mode = #tpu.pipeline_mode<synchronous>, transform_indices = @transform_11, window_bounds = array<i64: 9, 16, 64>}, {transform_indices = @transform_12, window_bounds = array<i64: 1, 16, 128>}, {transform_indices = @transform_13, window_bounds = array<i64: 1, 1, 128>}]} {
    %c0 = arith.constant 0 : index
    %c0_0 = arith.constant 0 : index
    %c0_1 = arith.constant 0 : index
    %0 = vector.load %arg1[%c0, %c0_0, %c0_1] : memref<1x64x128xbf16, #tpu.memory_space<vmem>>, vector<1x64x128xbf16>
    %1 = vector.shape_cast %0 : vector<1x64x128xbf16> to vector<64x128xbf16>
    %c0_2 = arith.constant 0 : index
    %c0_3 = arith.constant 0 : index
    %2 = vector.load %arg2[%c0_2, %c0_3] : memref<128x64xbf16, #tpu.memory_space<vmem>>, vector<128x64xbf16>
    %cst = arith.constant dense<0.000000e+00> : vector<64x64xf32>
    %3 = tpu.matmul %1, %2, %cst {dimension_numbers = #tpu.dot_dimension_numbers<[1], [0], [0], [1], [0, 0, 1, 1], [], []>} : vector<64x128xbf16>, vector<128x64xbf16>, vector<64x64xf32> -> vector<64x64xf32>
    %c0_4 = arith.constant 0 : index
    %c0_5 = arith.constant 0 : index
    %4 = vector.load %arg3[%c0_4, %c0_5] : memref<1x64xf32, #tpu.memory_space<vmem>>, vector<1x64xf32>
    %5 = vector.broadcast %4 : vector<1x64xf32> to vector<64x64xf32>
    %6 = arith.addf %3, %5 : vector<64x64xf32>
    %cst_6 = arith.constant 0.000000e+00 : f32
    %7 = vector.broadcast %cst_6 : f32 to vector<64x64xf32>
    %8 = arith.maximumf %6, %7 : vector<64x64xf32>
    %9 = arith.truncf %8 : vector<64x64xf32> to vector<64x64xbf16>
    %c4 = arith.constant 4 : index
    %c0_7 = arith.constant 0 : index
    %c0_8 = arith.constant 0 : index
    %10 = vector.load %arg12[%c4, %c0_7, %c0_8] : memref<9x16x64xbf16, #tpu.memory_space<vmem>>, vector<1x16x64xbf16>
    %11 = vector.shape_cast %10 : vector<1x16x64xbf16> to vector<16x64xbf16>
    %cst_9 = arith.constant dense<0.000000e+00> : vector<16x64xf32>
    %12 = tpu.matmul %11, %9, %cst_9 {dimension_numbers = #tpu.dot_dimension_numbers<[1], [0], [0], [1], [0, 0, 1, 1], [], []>} : vector<16x64xbf16>, vector<64x64xbf16>, vector<16x64xf32> -> vector<16x64xf32>
    %13 = arith.truncf %12 : vector<16x64xf32> to vector<16x64xbf16>
    %c0_10 = arith.constant 0 : index
    %c0_11 = arith.constant 0 : index
    %14 = vector.load %arg10[%c0_10, %c0_11] : memref<64x128xbf16, #tpu.memory_space<vmem>>, vector<64x128xbf16>
    %cst_12 = arith.constant dense<0.000000e+00> : vector<16x128xf32>
    %15 = tpu.matmul %13, %14, %cst_12 {dimension_numbers = #tpu.dot_dimension_numbers<[1], [0], [0], [1], [0, 0, 1, 1], [], []>} : vector<16x64xbf16>, vector<64x128xbf16>, vector<16x128xf32> -> vector<16x128xf32>
    %c0_13 = arith.constant 0 : index
    %c0_14 = arith.constant 0 : index
    %16 = vector.load %arg11[%c0_13, %c0_14] : memref<1x128xf32, #tpu.memory_space<vmem>>, vector<1x128xf32>
    %17 = vector.broadcast %16 : vector<1x128xf32> to vector<16x128xf32>
    %18 = arith.addf %15, %17 : vector<16x128xf32>
    %c0_15 = arith.constant 0 : index
    %c0_16 = arith.constant 0 : index
    %19 = vector.load %arg4[%c0_15, %c0_16] : memref<64x64xbf16, #tpu.memory_space<vmem>>, vector<64x64xbf16>
    %cst_17 = arith.constant dense<0.000000e+00> : vector<64x64xf32>
    %20 = tpu.matmul %9, %19, %cst_17 {dimension_numbers = #tpu.dot_dimension_numbers<[1], [0], [0], [1], [0, 0, 1, 1], [], []>} : vector<64x64xbf16>, vector<64x64xbf16>, vector<64x64xf32> -> vector<64x64xf32>
    %c0_18 = arith.constant 0 : index
    %c0_19 = arith.constant 0 : index
    %21 = vector.load %arg5[%c0_18, %c0_19] : memref<1x64xf32, #tpu.memory_space<vmem>>, vector<1x64xf32>
    %22 = vector.broadcast %21 : vector<1x64xf32> to vector<64x64xf32>
    %23 = arith.addf %20, %22 : vector<64x64xf32>
    %cst_20 = arith.constant 0.000000e+00 : f32
    %24 = vector.broadcast %cst_20 : f32 to vector<64x64xf32>
    %25 = arith.maximumf %23, %24 : vector<64x64xf32>
    %26 = arith.truncf %25 : vector<64x64xf32> to vector<64x64xbf16>
    %c0_21 = arith.constant 0 : index
    %c0_22 = arith.constant 0 : index
    %c0_23 = arith.constant 0 : index
    %27 = vector.load %arg12[%c0_21, %c0_22, %c0_23] : memref<9x16x64xbf16, #tpu.memory_space<vmem>>, vector<1x16x64xbf16>
    %28 = vector.shape_cast %27 : vector<1x16x64xbf16> to vector<16x64xbf16>
    %cst_24 = arith.constant dense<0.000000e+00> : vector<16x64xf32>
    %29 = tpu.matmul %28, %26, %cst_24 {dimension_numbers = #tpu.dot_dimension_numbers<[1], [0], [0], [1], [0, 0, 1, 1], [], []>} : vector<16x64xbf16>, vector<64x64xbf16>, vector<16x64xf32> -> vector<16x64xf32>
    %30 = arith.truncf %29 : vector<16x64xf32> to vector<16x64xbf16>
    %c0_25 = arith.constant 0 : index
    %c0_26 = arith.constant 0 : index
    %c0_27 = arith.constant 0 : index
    %31 = vector.load %arg6[%c0_25, %c0_26, %c0_27] : memref<9x64x64xbf16, #tpu.memory_space<vmem>>, vector<1x64x64xbf16>
    %32 = vector.shape_cast %31 : vector<1x64x64xbf16> to vector<64x64xbf16>
    %cst_28 = arith.constant dense<0.000000e+00> : vector<16x64xf32>
    %33 = tpu.matmul %30, %32, %cst_28 {dimension_numbers = #tpu.dot_dimension_numbers<[1], [0], [0], [1], [0, 0, 1, 1], [], []>} : vector<16x64xbf16>, vector<64x64xbf16>, vector<16x64xf32> -> vector<16x64xf32>
    %c1 = arith.constant 1 : index
    %c0_29 = arith.constant 0 : index
    %c0_30 = arith.constant 0 : index
    %34 = vector.load %arg12[%c1, %c0_29, %c0_30] : memref<9x16x64xbf16, #tpu.memory_space<vmem>>, vector<1x16x64xbf16>
    %35 = vector.shape_cast %34 : vector<1x16x64xbf16> to vector<16x64xbf16>
    %cst_31 = arith.constant dense<0.000000e+00> : vector<16x64xf32>
    %36 = tpu.matmul %35, %26, %cst_31 {dimension_numbers = #tpu.dot_dimension_numbers<[1], [0], [0], [1], [0, 0, 1, 1], [], []>} : vector<16x64xbf16>, vector<64x64xbf16>, vector<16x64xf32> -> vector<16x64xf32>
    %37 = arith.truncf %36 : vector<16x64xf32> to vector<16x64xbf16>
    %c1_32 = arith.constant 1 : index
    %c0_33 = arith.constant 0 : index
    %c0_34 = arith.constant 0 : index
    %38 = vector.load %arg6[%c1_32, %c0_33, %c0_34] : memref<9x64x64xbf16, #tpu.memory_space<vmem>>, vector<1x64x64xbf16>
    %39 = vector.shape_cast %38 : vector<1x64x64xbf16> to vector<64x64xbf16>
    %cst_35 = arith.constant dense<0.000000e+00> : vector<16x64xf32>
    %40 = tpu.matmul %37, %39, %cst_35 {dimension_numbers = #tpu.dot_dimension_numbers<[1], [0], [0], [1], [0, 0, 1, 1], [], []>} : vector<16x64xbf16>, vector<64x64xbf16>, vector<16x64xf32> -> vector<16x64xf32>
    %41 = arith.addf %33, %40 : vector<16x64xf32>
    %c2 = arith.constant 2 : index
    %c0_36 = arith.constant 0 : index
    %c0_37 = arith.constant 0 : index
    %42 = vector.load %arg12[%c2, %c0_36, %c0_37] : memref<9x16x64xbf16, #tpu.memory_space<vmem>>, vector<1x16x64xbf16>
    %43 = vector.shape_cast %42 : vector<1x16x64xbf16> to vector<16x64xbf16>
    %cst_38 = arith.constant dense<0.000000e+00> : vector<16x64xf32>
    %44 = tpu.matmul %43, %26, %cst_38 {dimension_numbers = #tpu.dot_dimension_numbers<[1], [0], [0], [1], [0, 0, 1, 1], [], []>} : vector<16x64xbf16>, vector<64x64xbf16>, vector<16x64xf32> -> vector<16x64xf32>
    %45 = arith.truncf %44 : vector<16x64xf32> to vector<16x64xbf16>
    %c2_39 = arith.constant 2 : index
    %c0_40 = arith.constant 0 : index
    %c0_41 = arith.constant 0 : index
    %46 = vector.load %arg6[%c2_39, %c0_40, %c0_41] : memref<9x64x64xbf16, #tpu.memory_space<vmem>>, vector<1x64x64xbf16>
    %47 = vector.shape_cast %46 : vector<1x64x64xbf16> to vector<64x64xbf16>
    %cst_42 = arith.constant dense<0.000000e+00> : vector<16x64xf32>
    %48 = tpu.matmul %45, %47, %cst_42 {dimension_numbers = #tpu.dot_dimension_numbers<[1], [0], [0], [1], [0, 0, 1, 1], [], []>} : vector<16x64xbf16>, vector<64x64xbf16>, vector<16x64xf32> -> vector<16x64xf32>
    %49 = arith.addf %41, %48 : vector<16x64xf32>
    %c3 = arith.constant 3 : index
    %c0_43 = arith.constant 0 : index
    %c0_44 = arith.constant 0 : index
    %50 = vector.load %arg12[%c3, %c0_43, %c0_44] : memref<9x16x64xbf16, #tpu.memory_space<vmem>>, vector<1x16x64xbf16>
    %51 = vector.shape_cast %50 : vector<1x16x64xbf16> to vector<16x64xbf16>
    %cst_45 = arith.constant dense<0.000000e+00> : vector<16x64xf32>
    %52 = tpu.matmul %51, %26, %cst_45 {dimension_numbers = #tpu.dot_dimension_numbers<[1], [0], [0], [1], [0, 0, 1, 1], [], []>} : vector<16x64xbf16>, vector<64x64xbf16>, vector<16x64xf32> -> vector<16x64xf32>
    %53 = arith.truncf %52 : vector<16x64xf32> to vector<16x64xbf16>
    %c3_46 = arith.constant 3 : index
    %c0_47 = arith.constant 0 : index
    %c0_48 = arith.constant 0 : index
    %54 = vector.load %arg6[%c3_46, %c0_47, %c0_48] : memref<9x64x64xbf16, #tpu.memory_space<vmem>>, vector<1x64x64xbf16>
    %55 = vector.shape_cast %54 : vector<1x64x64xbf16> to vector<64x64xbf16>
    %cst_49 = arith.constant dense<0.000000e+00> : vector<16x64xf32>
    %56 = tpu.matmul %53, %55, %cst_49 {dimension_numbers = #tpu.dot_dimension_numbers<[1], [0], [0], [1], [0, 0, 1, 1], [], []>} : vector<16x64xbf16>, vector<64x64xbf16>, vector<16x64xf32> -> vector<16x64xf32>
    %57 = arith.addf %49, %56 : vector<16x64xf32>
    %c4_50 = arith.constant 4 : index
    %c0_51 = arith.constant 0 : index
    %c0_52 = arith.constant 0 : index
    %58 = vector.load %arg12[%c4_50, %c0_51, %c0_52] : memref<9x16x64xbf16, #tpu.memory_space<vmem>>, vector<1x16x64xbf16>
    %59 = vector.shape_cast %58 : vector<1x16x64xbf16> to vector<16x64xbf16>
    %cst_53 = arith.constant dense<0.000000e+00> : vector<16x64xf32>
    %60 = tpu.matmul %59, %26, %cst_53 {dimension_numbers = #tpu.dot_dimension_numbers<[1], [0], [0], [1], [0, 0, 1, 1], [], []>} : vector<16x64xbf16>, vector<64x64xbf16>, vector<16x64xf32> -> vector<16x64xf32>
    %61 = arith.truncf %60 : vector<16x64xf32> to vector<16x64xbf16>
    %c4_54 = arith.constant 4 : index
    %c0_55 = arith.constant 0 : index
    %c0_56 = arith.constant 0 : index
    %62 = vector.load %arg6[%c4_54, %c0_55, %c0_56] : memref<9x64x64xbf16, #tpu.memory_space<vmem>>, vector<1x64x64xbf16>
    %63 = vector.shape_cast %62 : vector<1x64x64xbf16> to vector<64x64xbf16>
    %cst_57 = arith.constant dense<0.000000e+00> : vector<16x64xf32>
    %64 = tpu.matmul %61, %63, %cst_57 {dimension_numbers = #tpu.dot_dimension_numbers<[1], [0], [0], [1], [0, 0, 1, 1], [], []>} : vector<16x64xbf16>, vector<64x64xbf16>, vector<16x64xf32> -> vector<16x64xf32>
    %65 = arith.addf %57, %64 : vector<16x64xf32>
    %c5 = arith.constant 5 : index
    %c0_58 = arith.constant 0 : index
    %c0_59 = arith.constant 0 : index
    %66 = vector.load %arg12[%c5, %c0_58, %c0_59] : memref<9x16x64xbf16, #tpu.memory_space<vmem>>, vector<1x16x64xbf16>
    %67 = vector.shape_cast %66 : vector<1x16x64xbf16> to vector<16x64xbf16>
    %cst_60 = arith.constant dense<0.000000e+00> : vector<16x64xf32>
    %68 = tpu.matmul %67, %26, %cst_60 {dimension_numbers = #tpu.dot_dimension_numbers<[1], [0], [0], [1], [0, 0, 1, 1], [], []>} : vector<16x64xbf16>, vector<64x64xbf16>, vector<16x64xf32> -> vector<16x64xf32>
    %69 = arith.truncf %68 : vector<16x64xf32> to vector<16x64xbf16>
    %c5_61 = arith.constant 5 : index
    %c0_62 = arith.constant 0 : index
    %c0_63 = arith.constant 0 : index
    %70 = vector.load %arg6[%c5_61, %c0_62, %c0_63] : memref<9x64x64xbf16, #tpu.memory_space<vmem>>, vector<1x64x64xbf16>
    %71 = vector.shape_cast %70 : vector<1x64x64xbf16> to vector<64x64xbf16>
    %cst_64 = arith.constant dense<0.000000e+00> : vector<16x64xf32>
    %72 = tpu.matmul %69, %71, %cst_64 {dimension_numbers = #tpu.dot_dimension_numbers<[1], [0], [0], [1], [0, 0, 1, 1], [], []>} : vector<16x64xbf16>, vector<64x64xbf16>, vector<16x64xf32> -> vector<16x64xf32>
    %73 = arith.addf %65, %72 : vector<16x64xf32>
    %c6 = arith.constant 6 : index
    %c0_65 = arith.constant 0 : index
    %c0_66 = arith.constant 0 : index
    %74 = vector.load %arg12[%c6, %c0_65, %c0_66] : memref<9x16x64xbf16, #tpu.memory_space<vmem>>, vector<1x16x64xbf16>
    %75 = vector.shape_cast %74 : vector<1x16x64xbf16> to vector<16x64xbf16>
    %cst_67 = arith.constant dense<0.000000e+00> : vector<16x64xf32>
    %76 = tpu.matmul %75, %26, %cst_67 {dimension_numbers = #tpu.dot_dimension_numbers<[1], [0], [0], [1], [0, 0, 1, 1], [], []>} : vector<16x64xbf16>, vector<64x64xbf16>, vector<16x64xf32> -> vector<16x64xf32>
    %77 = arith.truncf %76 : vector<16x64xf32> to vector<16x64xbf16>
    %c6_68 = arith.constant 6 : index
    %c0_69 = arith.constant 0 : index
    %c0_70 = arith.constant 0 : index
    %78 = vector.load %arg6[%c6_68, %c0_69, %c0_70] : memref<9x64x64xbf16, #tpu.memory_space<vmem>>, vector<1x64x64xbf16>
    %79 = vector.shape_cast %78 : vector<1x64x64xbf16> to vector<64x64xbf16>
    %cst_71 = arith.constant dense<0.000000e+00> : vector<16x64xf32>
    %80 = tpu.matmul %77, %79, %cst_71 {dimension_numbers = #tpu.dot_dimension_numbers<[1], [0], [0], [1], [0, 0, 1, 1], [], []>} : vector<16x64xbf16>, vector<64x64xbf16>, vector<16x64xf32> -> vector<16x64xf32>
    %81 = arith.addf %73, %80 : vector<16x64xf32>
    %c7 = arith.constant 7 : index
    %c0_72 = arith.constant 0 : index
    %c0_73 = arith.constant 0 : index
    %82 = vector.load %arg12[%c7, %c0_72, %c0_73] : memref<9x16x64xbf16, #tpu.memory_space<vmem>>, vector<1x16x64xbf16>
    %83 = vector.shape_cast %82 : vector<1x16x64xbf16> to vector<16x64xbf16>
    %cst_74 = arith.constant dense<0.000000e+00> : vector<16x64xf32>
    %84 = tpu.matmul %83, %26, %cst_74 {dimension_numbers = #tpu.dot_dimension_numbers<[1], [0], [0], [1], [0, 0, 1, 1], [], []>} : vector<16x64xbf16>, vector<64x64xbf16>, vector<16x64xf32> -> vector<16x64xf32>
    %85 = arith.truncf %84 : vector<16x64xf32> to vector<16x64xbf16>
    %c7_75 = arith.constant 7 : index
    %c0_76 = arith.constant 0 : index
    %c0_77 = arith.constant 0 : index
    %86 = vector.load %arg6[%c7_75, %c0_76, %c0_77] : memref<9x64x64xbf16, #tpu.memory_space<vmem>>, vector<1x64x64xbf16>
    %87 = vector.shape_cast %86 : vector<1x64x64xbf16> to vector<64x64xbf16>
    %cst_78 = arith.constant dense<0.000000e+00> : vector<16x64xf32>
    %88 = tpu.matmul %85, %87, %cst_78 {dimension_numbers = #tpu.dot_dimension_numbers<[1], [0], [0], [1], [0, 0, 1, 1], [], []>} : vector<16x64xbf16>, vector<64x64xbf16>, vector<16x64xf32> -> vector<16x64xf32>
    %89 = arith.addf %81, %88 : vector<16x64xf32>
    %c8 = arith.constant 8 : index
    %c0_79 = arith.constant 0 : index
    %c0_80 = arith.constant 0 : index
    %90 = vector.load %arg12[%c8, %c0_79, %c0_80] : memref<9x16x64xbf16, #tpu.memory_space<vmem>>, vector<1x16x64xbf16>
    %91 = vector.shape_cast %90 : vector<1x16x64xbf16> to vector<16x64xbf16>
    %cst_81 = arith.constant dense<0.000000e+00> : vector<16x64xf32>
    %92 = tpu.matmul %91, %26, %cst_81 {dimension_numbers = #tpu.dot_dimension_numbers<[1], [0], [0], [1], [0, 0, 1, 1], [], []>} : vector<16x64xbf16>, vector<64x64xbf16>, vector<16x64xf32> -> vector<16x64xf32>
    %93 = arith.truncf %92 : vector<16x64xf32> to vector<16x64xbf16>
    %c8_82 = arith.constant 8 : index
    %c0_83 = arith.constant 0 : index
    %c0_84 = arith.constant 0 : index
    %94 = vector.load %arg6[%c8_82, %c0_83, %c0_84] : memref<9x64x64xbf16, #tpu.memory_space<vmem>>, vector<1x64x64xbf16>
    %95 = vector.shape_cast %94 : vector<1x64x64xbf16> to vector<64x64xbf16>
    %cst_85 = arith.constant dense<0.000000e+00> : vector<16x64xf32>
    %96 = tpu.matmul %93, %95, %cst_85 {dimension_numbers = #tpu.dot_dimension_numbers<[1], [0], [0], [1], [0, 0, 1, 1], [], []>} : vector<16x64xbf16>, vector<64x64xbf16>, vector<16x64xf32> -> vector<16x64xf32>
    %97 = arith.addf %89, %96 : vector<16x64xf32>
    %c0_86 = arith.constant 0 : index
    %c0_87 = arith.constant 0 : index
    %98 = vector.load %arg7[%c0_86, %c0_87] : memref<1x64xf32, #tpu.memory_space<vmem>>, vector<1x64xf32>
    %99 = vector.broadcast %98 : vector<1x64xf32> to vector<16x64xf32>
    %100 = arith.addf %97, %99 : vector<16x64xf32>
    %cst_88 = arith.constant 0.000000e+00 : f32
    %101 = vector.broadcast %cst_88 : f32 to vector<16x64xf32>
    %102 = arith.maximumf %100, %101 : vector<16x64xf32>
    %103 = arith.truncf %102 : vector<16x64xf32> to vector<16x64xbf16>
    %c0_89 = arith.constant 0 : index
    %c0_90 = arith.constant 0 : index
    %104 = vector.load %arg8[%c0_89, %c0_90] : memref<64x128xbf16, #tpu.memory_space<vmem>>, vector<64x128xbf16>
    %cst_91 = arith.constant dense<0.000000e+00> : vector<16x128xf32>
    %105 = tpu.matmul %103, %104, %cst_91 {dimension_numbers = #tpu.dot_dimension_numbers<[1], [0], [0], [1], [0, 0, 1, 1], [], []>} : vector<16x64xbf16>, vector<64x128xbf16>, vector<16x128xf32> -> vector<16x128xf32>
    %c0_92 = arith.constant 0 : index
    %c0_93 = arith.constant 0 : index
    %106 = vector.load %arg9[%c0_92, %c0_93] : memref<1x128xf32, #tpu.memory_space<vmem>>, vector<1x128xf32>
    %107 = vector.broadcast %106 : vector<1x128xf32> to vector<16x128xf32>
    %108 = arith.addf %105, %107 : vector<16x128xf32>
    %109 = arith.addf %108, %18 : vector<16x128xf32>
    %cst_94 = arith.constant 0.000000e+00 : f32
    %110 = vector.broadcast %cst_94 : f32 to vector<16x128xf32>
    %111 = arith.maximumf %109, %110 : vector<16x128xf32>
    %c0_95 = arith.constant 0 : index
    %c0_96 = arith.constant 0 : index
    %c0_97 = arith.constant 0 : index
    %112 = vector.load %arg13[%c0_95, %c0_96, %c0_97] : memref<1x16x128xf32, #tpu.memory_space<vmem>>, vector<1x16x128xf32>
    %113 = vector.shape_cast %112 : vector<1x16x128xf32> to vector<16x128xf32>
    %114 = vector.shape_cast %111 : vector<16x128xf32> to vector<1x16x128xf32>
    tpu.vector_store %arg13[%c0_95, %c0_96, %c0_97], %114 {strides = array<i32>} : memref<1x16x128xf32, #tpu.memory_space<vmem>>, vector<1x16x128xf32>,
    %cst_98 = arith.constant dense<0.000000e+00> : vector<128xf32>
    %115 = vector.multi_reduction <add>, %111, %cst_98 [0] : vector<16x128xf32> to vector<128xf32>
    %116 = vector.shape_cast %115 : vector<128xf32> to vector<1x128xf32>
    %cst_99 = arith.constant 6.250000e-02 : f32
    %117 = vector.broadcast %cst_99 : f32 to vector<1x128xf32>
    %118 = arith.mulf %116, %117 : vector<1x128xf32>
    %c0_100 = arith.constant 0 : index
    %c0_101 = arith.constant 0 : index
    %c0_102 = arith.constant 0 : index
    %119 = vector.load %arg14[%c0_100, %c0_101, %c0_102] : memref<1x1x128xf32, #tpu.memory_space<vmem>>, vector<1x1x128xf32>
    %120 = vector.shape_cast %119 : vector<1x1x128xf32> to vector<1x128xf32>
    %121 = vector.shape_cast %118 : vector<1x128xf32> to vector<1x1x128xf32>
    tpu.vector_store %arg14[%c0_100, %c0_101, %c0_102], %121 {strides = array<i32>} : memref<1x1x128xf32, #tpu.memory_space<vmem>>, vector<1x1x128xf32>,
    return
  }
  func.func @transform_0(%arg0: i32) -> (i32, i32, i32) {
    %c0_i32 = arith.constant 0 : i32
    %c0_i32_0 = arith.constant 0 : i32
    %c0_i32_1 = arith.constant 0 : i32
    return %arg0, %c0_i32, %c0_i32_0 : i32, i32, i32
  }
  func.func @transform_1(%arg0: i32) -> (i32, i32) {
    %c0_i32 = arith.constant 0 : i32
    %c0_i32_0 = arith.constant 0 : i32
    %c0_i32_1 = arith.constant 0 : i32
    return %c0_i32, %c0_i32_0 : i32, i32
  }
  func.func @transform_2(%arg0: i32) -> (i32, i32) {
    %c0_i32 = arith.constant 0 : i32
    %c0_i32_0 = arith.constant 0 : i32
    %c0_i32_1 = arith.constant 0 : i32
    return %c0_i32, %c0_i32_0 : i32, i32
  }
  func.func @transform_3(%arg0: i32) -> (i32, i32) {
    %c0_i32 = arith.constant 0 : i32
    %c0_i32_0 = arith.constant 0 : i32
    %c0_i32_1 = arith.constant 0 : i32
    return %c0_i32, %c0_i32_0 : i32, i32
  }
  func.func @transform_4(%arg0: i32) -> (i32, i32) {
    %c0_i32 = arith.constant 0 : i32
    %c0_i32_0 = arith.constant 0 : i32
    %c0_i32_1 = arith.constant 0 : i32
    return %c0_i32, %c0_i32_0 : i32, i32
  }
  func.func @transform_5(%arg0: i32) -> (i32, i32, i32) {
    %c0_i32 = arith.constant 0 : i32
    %c0_i32_0 = arith.constant 0 : i32
    %c0_i32_1 = arith.constant 0 : i32
    %c0_i32_2 = arith.constant 0 : i32
    return %c0_i32, %c0_i32_0, %c0_i32_1 : i32, i32, i32
  }
  func.func @transform_6(%arg0: i32) -> (i32, i32) {
    %c0_i32 = arith.constant 0 : i32
    %c0_i32_0 = arith.constant 0 : i32
    %c0_i32_1 = arith.constant 0 : i32
    return %c0_i32, %c0_i32_0 : i32, i32
  }
  func.func @transform_7(%arg0: i32) -> (i32, i32) {
    %c0_i32 = arith.constant 0 : i32
    %c0_i32_0 = arith.constant 0 : i32
    %c0_i32_1 = arith.constant 0 : i32
    return %c0_i32, %c0_i32_0 : i32, i32
  }
  func.func @transform_8(%arg0: i32) -> (i32, i32) {
    %c0_i32 = arith.constant 0 : i32
    %c0_i32_0 = arith.constant 0 : i32
    %c0_i32_1 = arith.constant 0 : i32
    return %c0_i32, %c0_i32_0 : i32, i32
  }
  func.func @transform_9(%arg0: i32) -> (i32, i32) {
    %c0_i32 = arith.constant 0 : i32
    %c0_i32_0 = arith.constant 0 : i32
    %c0_i32_1 = arith.constant 0 : i32
    return %c0_i32, %c0_i32_0 : i32, i32
  }
  func.func @transform_10(%arg0: i32) -> (i32, i32) {
    %c0_i32 = arith.constant 0 : i32
    %c0_i32_0 = arith.constant 0 : i32
    %c0_i32_1 = arith.constant 0 : i32
    return %c0_i32, %c0_i32_0 : i32, i32
  }
  func.func @transform_11(%arg0: i32) -> (i32, i32, i32) {
    %c0_i32 = arith.constant 0 : i32
    %c0_i32_0 = arith.constant 0 : i32
    %c0_i32_1 = arith.constant 0 : i32
    %c0_i32_2 = arith.constant 0 : i32
    return %c0_i32, %c0_i32_0, %c0_i32_1 : i32, i32, i32
  }
  func.func @transform_12(%arg0: i32) -> (i32, i32, i32) {
    %c0_i32 = arith.constant 0 : i32
    %c0_i32_0 = arith.constant 0 : i32
    %c0_i32_1 = arith.constant 0 : i32
    return %arg0, %c0_i32, %c0_i32_0 : i32, i32, i32
  }
  func.func @transform_13(%arg0: i32) -> (i32, i32, i32) {
    %c0_i32 = arith.constant 0 : i32
    %c0_i32_0 = arith.constant 0 : i32
    %c0_i32_1 = arith.constant 0 : i32
    return %arg0, %c0_i32, %c0_i32_0 : i32, i32, i32
  }
}

</mosaic_0001>

<bundles_post_ra>
// kernel: resnet_forward.1
= control target key start
LH: loop header
LB: loop body
LE: loop exit
PB: predicated region body
PF: predicated region fallthrough
CT: control target
= control target key end

     0   :  { %s2724_s0 = inlined_call_operand.vmem [shape: bf16[2,64,128], index: 0, kind: input, shape index: {}]   ;;  %s2725_s1 = inlined_call_operand.vmem [shape: bf16[128,64], index: 1, kind: input, shape index: {}]   ;;  %s2726_s2 = inlined_call_operand.vmem [shape: f32[1,64], index: 2, kind: input, shape index: {}]   ;;  %s2727_s3 = inlined_call_operand.vmem [shape: bf16[64,64], index: 3, kind: input, shape index: {}]   ;;  %s2728_s4 = inlined_call_operand.vmem [shape: f32[1,64], index: 4, kind: input, shape index: {}]   ;;  %s2729_s5 = inlined_call_operand.vmem [shape: bf16[9,64,64], index: 5, kind: input, shape index: {}]   ;;  %s2730_s6 = inlined_call_operand.vmem [shape: f32[1,64], index: 6, kind: input, shape index: {}]   ;;  %s2731_s7 = inlined_call_operand.vmem [shape: bf16[64,128], index: 7, kind: input, shape index: {}]   ;;  %s2732_s8 = inlined_call_operand.vmem [shape: f32[1,128], index: 8, kind: input, shape index: {}]   ;;  %s2733_s9 = inlined_call_operand.vmem [shape: bf16[64,128], index: 9, kind: input, shape index: {}]   ;;  %s2734_s10 = inlined_call_operand.vmem [shape: f32[1,128], index: 10, kind: input, shape index: {}]   ;;  %s2735_s11 = inlined_call_operand.vmem [shape: bf16[9,16,64], index: 11, kind: input, shape index: {}]   ;;  %s2736_s12 = inlined_call_operand.hbm [shape: f32[2,16,128], index: 12, kind: output, shape index: {0}]   ;;  %s2737_s13 = inlined_call_operand.hbm [shape: f32[2,1,128], index: 13, kind: output, shape index: {1}]  }
   0x1   :  { %2741 = sst [smem:[#allocation11_spill]] %s2724_s0 }
   0x2   :  { %2742 = sst [smem:[#allocation12_spill]] %s2725_s1 }
   0x3   :  { %19 = vsyncpa [#allocation3], 0 }
   0x4   :  { %21 = vsyncpa [#allocation3 + $0x1], 0 }
   0x5   :  { %22 = vsyncpa [#allocation5], 0 }
   0x6   :  { %24 = vsyncpa [#allocation5 + $0x1], 0  ;;  %s2328_s25 = smov 0   ;;  %s2330_s26 = smov 0  }
   0x7   :  { %s2332_s27 = smov 0   ;;  %s2334_s28 = smov 0  }
   0x8 LB: > { %2743 = sst [smem:[#allocation8_spill]] %s2250_s27  ;;  %s2349_s29 = sadd.s32 4294967295, %s2254_s28   ;;  %s2254_s28 = sphi %s2334_s28, %s2750_s28   ;;  %s2250_s27 = sphi %s2332_s27, %s2752_s27   ;;  %s2246_s26 = sphi %s2330_s26, %s2754_s26   ;;  %s2242_s25 = sphi %s2328_s25, %s2753_s25  }
   0x9   : > { %s1645_s30 = sadd.s32 4294967294, %s2254_s28   ;;  %s2353_s14 = sadd.s32 1, %s2254_s28  }
   0xa   : > { %2744 = sst [smem:[#allocation9_spill]] %s2353_s14  ;;  %s294_s15 = sadd.s32 1, %s2250_s27 }
   0xb   : > { %s291_s16 = ssub.s32 %s2254_s28, %s2353_s14  ;;  %p304_p0 = scmp.ne.s32.totalorder %s2250_s27, %s2246_s26 }
   0xc   : > { %p292_p1 = scmp.eq.s32.totalorder %s291_s16, 0  ;;  %p305_p2 = scmp.eq.s32.totalorder %s2349_s29, 1 }
   0xd   : > { %p310_p3 = scmp.ne.s32.totalorder %s2246_s26, %s2242_s25  ;;  %p311_p4 = scmp.eq.s32.totalorder %s1645_s30, 1 }
   0xe   : > { %s2364_s17 = scalar_select %p292_p1, %s2250_s27, %s294_s15  }
   0xf   : > { %p2366_p5 = por %p305_p2, %p304_p0  ;;  %p2370_p6 = por %p311_p4, %p310_p3 }
  0x10   : > { %2745 = sst [smem:[#allocation10_spill]] %s2364_s17  ;;  %p1648_p7 = scmp.ge.s32.totalorder %s2254_s28, 1 }
  0x11   : > { %p396_p8 = scmp.lt.s32.totalorder %s2254_s28, 3 }
  0x13   : > { %p397_p9 = pnand %p1648_p7, %p396_p8 }
  0x14   : > { %s2748_s1 = sld [smem:[#allocation12_spill]] (!%p397_p9)  ;;  %p444_p10 = scmp.lt.s32.totalorder (!%p397_p9), %s2349_s29, 1 }
  0x15   : > { %400 = sbr.rel (%p397_p9) target bundleno = 1064 (0x428), region = 68  ;;  %s2749_s0 = sld [smem:[#allocation11_spill]] (!%p397_p9) }
  0x16   : > { %s2671_s24 = sand.u32 (!%p397_p9), 1, %s2246_s26   ;;  %s2108_s30 = sshll.u32 (!%p397_p9), %s2349_s29, 4 }
  0x17   : > { %s1538_s20 = scalar_lea.hbm (!%p397_p9), %s2736_s12, %s2108_s30  ;;  %s1523_s22 = scalar_lea.sflag (!%p397_p9), [#allocation3], %s2671_s24 }
  0x18   : > { %s1541_s17 = sshll.u32 (!%p397_p9), %s1538_s20, 4  ;;  %s1542_s17 = int_to_ptr.hbm [resolvable:$true] %s1541_s17 }
  0x1a   : > { %v2050_v0 = vld [vmem:[%s2748_s1 + $0x38] sm:$0xff]  ;;  %v2049_v1 = vld [vmem:[%s2748_s1 + $0x30] sm:$0xff]  ;;  %v2048_v2 = vld [vmem:[%s2748_s1 + $0x28] sm:$0xff]  ;;  %s445_s23 = scalar_select %p444_p10, %s2349_s29, 1  ;;  %vm599_vm0 = vcmask 523264  }
  0x1b   : > { %550 = vmatpush.bf16.msra.mxu0 %v2050_v0  ;;  %v2047_v3 = vld [vmem:[%s2748_s1 + $0x20] sm:$0xff]  ;;  %v2046_v4 = vld [vmem:[%s2748_s1 + $0x18] sm:$0xff]  ;;  %v2045_v5 = vld [vmem:[%s2748_s1 + $0x10] sm:$0xff] }
  0x1c   : > { %v2044_v6 = vld [vmem:[%s2748_s1 + $0x8] sm:$0xff]  ;;  %s2038_s27 = sshll.u32 %s445_s23, 5  ;;  %v2043_v7 = vld [vmem:[%s2748_s1] sm:$0xff]  ;;  %v2059_v12 = vld [vmem:[%s2727_s3 + $0x18] sm:$0xff]  ;;  %s2174_s23 = sshra.s32 %s1542_s17, 4  ;;  %s2175_s23 = int_to_ptr.hbm [resolvable:$true] %s2174_s23 }
  0x1d   : > { %s448_s14 = scalar_lea.vmem %s2749_s0, %s2038_s27  ;;  %723 = vmatpush.bf16.msra.mxu3 %v2059_v12  ;;  %v2058_v13 = vld [vmem:[%s2727_s3 + $0x10] sm:$0xff]  ;;  %v2057_v14 = vld [vmem:[%s2727_s3 + $0x8] sm:$0xff]  ;;  %v2056_v15 = vld [vmem:[%s2727_s3] sm:$0xff]  ;;  %s1649_s27 = sshll.u32 %s2671_s24, 4 }
  0x1e   : > { %v2039_v8 = vld [vmem:[%s448_s14] sm:$0xff]  ;;  %v2040_v9 = vld [vmem:[%s448_s14 + $0x8] sm:$0xff]  ;;  %v2041_v10 = vld [vmem:[%s448_s14 + $0x10] sm:$0xff]  ;;  %s437_s15 = scalar_lea.vmem [#allocation2], %s1649_s27  ;;  %s2176_s27 = scalar_lea.hbm %s2175_s23, 16 }
  0x1f   : > { %551 = vmatpush.bf16.msra.mxu0 %v2049_v1  ;;  %v2042_v11 = vld [vmem:[%s448_s14 + $0x18] sm:$0xff]  ;;  %v2155_v17 = vld [vmem:[%s2726_s2] ss:$0 sm:$0xff]  ;;  %v2054_v50 = vld [vmem:[%s2733_s9 + $0x10] sm:$0xff]  ;;  %s1539_s21 = sshll.u32 %s437_s15, 4  ;;  %p2177_p11 = scmp.ne.s32.totalorder %s2175_s23, %s2176_s27  ;;  %s1540_s21 = int_to_ptr.vmem [resolvable:$true] %s1539_s21 }
  0x20   : > { %v2051_v45 = vld [vmem:[%s2735_s11 + $0x20] sm:$0xff]  ;;  %v2055_v49 = vld [vmem:[%s2733_s9 + $0x18] sm:$0xff]  ;;  %v2053_v52 = vld [vmem:[%s2733_s9 + $0x8] sm:$0xff]  ;;  %s2180_s14 = scalar_lea.hbm %s2736_s12, 32  ;;  %p2181_p0 = scmp.lt.s32.totalorder %s2175_s23, %s2736_s12 }
  0x21   : > { %724 = vmatpush.bf16.msra.mxu3 %v2058_v13  ;;  %661 = vmatpush.bf16.msra.mxu2 %v2055_v49  ;;  %v2052_v53 = vld [vmem:[%s2733_s9] sm:$0xff]  ;;  %p2178_p12 = pnand %p2177_p11, %p2366_p5  ;;  %p2182_p1 = scmp.lt.s32.totalorder %s2180_s14, %s2176_s27 }
  0x22   : > { %v2156_v57 = vld [vmem:[%s2728_s4] ss:$0 sm:$0xff] }
  0x23   : > { %552 = vmatpush.bf16.msra.mxu0 %v2048_v2  ;;  %p2179_p13 = pneg %p2178_p12  ;;  %p2183_p2 = por %p2182_p1, %p2181_p0 }
  0x25   : > { %725 = vmatpush.bf16.msra.mxu3 %v2057_v14  ;;  %662 = vmatpush.bf16.msra.mxu2 %v2054_v50  ;;  %v2079_v50 = vld [vmem:[%s2729_s5 + $0x78] sm:$0xff]  ;;  %p2184_p3 = pnand %p2183_p2, %p2179_p13 }
  0x27   : > { %553 = vmatpush.bf16.msra.mxu0 %v2047_v3 }
  0x29   : > { %726 = vmatpush.bf16.msra.mxu3 %v2056_v15  ;;  %663 = vmatpush.bf16.msra.mxu2 %v2053_v52  ;;  %v2080_v52 = vld [vmem:[%s2729_s5 + $0x80] sm:$0xff] }
  0x2b   : > { %554 = vmatpush.bf16.msra.mxu0 %v2046_v4 }
  0x2d   : > { %664 = vmatpush.bf16.msra.mxu2 %v2052_v53 }
  0x2f   : > { %555 = vmatpush.bf16.msra.mxu0 %v2045_v5 }
  0x33   : > { %556 = vmatpush.bf16.msra.mxu0 %v2044_v6 }
  0x37   : > { %557 = vmatpush.bf16.msra.mxu0 %v2043_v7 }
  0x3a   : > { %558 = vmatmul.bf16.vlgmr.msra.gmra.mxu0 %v2039_v8 }
  0x4a   : > { %563 = vmatmul.bf16.gmra.mxu0 %v2040_v9 }
  0x5a   : > { %568 = vmatmul.bf16.gmra.mxu0 %v2041_v10 }
  0x6a   : > { %573 = vmatmul.bf16.gmra.mxu0 %v2042_v11 }
  0xb7   : > { %v559_v16 = vpop.f32.mrf.mxu0 }
  0xb8   : > { %v560_v18 = vadd.f32 %v2155_v17, %v559_v16 }
  0xba   : > { %v579_v21 = vmax.f32 %v560_v18, 0.0 }
  0xbf   : > { %v561_v19 = vpop.f32.mrf.mxu0 }
  0xc0   : > { %v562_v20 = vadd.f32 %v2155_v17, %v561_v19  ;;  %v2060_v19 = vld [vmem:[%s2735_s11] sm:$0xff] }
  0xc2   : > { %v580_v22 = vmax.f32 %v562_v20, 0.0  ;;  %v2068_v20 = vld [vmem:[%s2729_s5 + $0x30] sm:$0xff] }
  0xc4   : > { %v587_v23 = vpack.c.bf16 %v580_v22, %v579_v21  ;;  %v2065_v21 = vld [vmem:[%s2735_s11 + $0x8] sm:$0xff] }
  0xc5   : > { %v2067_v22 = vld [vmem:[%s2729_s5 + $0x28] sm:$0xff] }
  0xc6   : > { %1740 = vmatmul.msk.bf16.vlgmr.msra.gmra.mxu3 %vm599_vm0, %v587_v23 }
  0xc7   : > { %v564_v24 = vpop.f32.mrf.mxu0 }
  0xc8   : > { %v565_v25 = vadd.f32 %v2155_v17, %v564_v24  ;;  %v2064_v24 = vld [vmem:[%s2729_s5 + $0x18] sm:$0xff] }
  0xca   : > { %v581_v28 = vmax.f32 %v565_v25, 0.0  ;;  %v2063_v25 = vld [vmem:[%s2729_s5 + $0x10] sm:$0xff] }
  0xcf   : > { %v566_v26 = vpop.f32.mrf.mxu0 }
  0xd0   : > { %v567_v27 = vadd.f32 %v2155_v17, %v566_v26  ;;  %v2062_v26 = vld [vmem:[%s2729_s5 + $0x8] sm:$0xff] }
  0xd2   : > { %v582_v29 = vmax.f32 %v567_v27, 0.0  ;;  %v2061_v27 = vld [vmem:[%s2729_s5] sm:$0xff] }
  0xd4   : > { %v588_v30 = vpack.c.bf16 %v582_v29, %v581_v28 }
  0xd6   : > { %1741 = vmatmul.msk.bf16.gmra.mxu3 %vm599_vm0, %v588_v30 }
  0xd7   : > { %v569_v31 = vpop.f32.mrf.mxu0 }
  0xd8   : > { %v570_v32 = vadd.f32 %v2155_v17, %v569_v31 }
  0xda   : > { %v583_v35 = vmax.f32 %v570_v32, 0.0 }
  0xdf   : > { %v571_v33 = vpop.f32.mrf.mxu0 }
  0xe0   : > { %v572_v34 = vadd.f32 %v2155_v17, %v571_v33 }
  0xe2   : > { %v584_v36 = vmax.f32 %v572_v34, 0.0 }
  0xe4   : > { %v589_v37 = vpack.c.bf16 %v584_v36, %v583_v35  ;;  %v2089_v36 = vld [vmem:[%s2735_s11 + $0x30] sm:$0xff] }
  0xe6   : > { %1742 = vmatmul.msk.bf16.gmra.mxu3 %vm599_vm0, %v589_v37 }
  0xe7   : > { %v574_v38 = vpop.f32.mrf.mxu0 }
  0xe8   : > { %v575_v39 = vadd.f32 %v2155_v17, %v574_v38  ;;  %v2099_v38 = vld [vmem:[%s2735_s11 + $0x40] sm:$0xff] }
  0xea   : > { %v585_v42 = vmax.f32 %v575_v39, 0.0  ;;  %v2075_v39 = vld [vmem:[%s2735_s11 + $0x18] sm:$0xff] }
  0xef   : > { %v576_v40 = vpop.f32.mrf.mxu0 }
  0xf0   : > { %v577_v41 = vadd.f32 %v2155_v17, %v576_v40  ;;  %v2069_v17 = vld [vmem:[%s2729_s5 + $0x38] sm:$0xff] }
  0xf1   : > { %v2083_v40 = vld [vmem:[%s2729_s5 + $0x98] sm:$0xff] }
  0xf2   : > { %v586_v43 = vmax.f32 %v577_v41, 0.0  ;;  %1121 = vmatpush.bf16.msrb.mxu0 %v2083_v40  ;;  %v2084_v41 = vld [vmem:[%s2735_s11 + $0x28] sm:$0xff] }
  0xf4   : > { %v590_v44 = vpack.c.bf16 %v586_v43, %v585_v42  ;;  %v2094_v42 = vld [vmem:[%s2735_s11 + $0x38] sm:$0xff]  ;;  %v2082_v43 = vld [vmem:[%s2729_s5 + $0x90] sm:$0xff] }
  0xf6   : > { %607 = vmatpush.bf16.msra.mxu1 %v590_v44  ;;  %1743 = vmatmul.msk.bf16.gmra.mxu3 %vm599_vm0, %v590_v44  ;;  %v2074_v44 = vld [vmem:[%s2729_s5 + $0x58] sm:$0xff] }
  0xf7   : > { %1122 = vmatpush.bf16.msrb.mxu0 %v2082_v43  ;;  %v2104_v43 = vld [vmem:[%s2731_s7] sm:$0xff] }
  0xfa   : > { %608 = vmatpush.bf16.msra.mxu1 %v589_v37  ;;  %v2070_v37 = vld [vmem:[%s2735_s11 + $0x10] sm:$0xff] }
  0xfe   : > { %609 = vmatpush.bf16.msra.mxu1 %v588_v30 }
 0x102   : > { %610 = vmatpush.bf16.msra.mxu1 %v587_v23  ;;  %v2066_v23 = vld [vmem:[%s2729_s5 + $0x20] sm:$0xff] }
 0x105   : > { %1706 = vmatmul.msk.bf16.vlgmr.msra.gmra.mxu1 %vm599_vm0, %v2051_v45 }
 0x149   : > { %v728_v46 = vpop.f32.mrf.mxu3 }
 0x14a   : > { %v729_v12 = vadd.f32 %v2156_v57, %v728_v46  ;;  %v2072_v46 = vld [vmem:[%s2729_s5 + $0x48] sm:$0xff] }
 0x14c   : > { %v748_v16 = vmax.f32 %v729_v12, 0.0 }
 0x151   : > { %v730_v47 = vpop.f32.mrf.mxu3 }
 0x152   : > { %v731_v7 = vadd.f32 %v2156_v57, %v730_v47  ;;  %v2081_v47 = vld [vmem:[%s2729_s5 + $0x88] sm:$0xff] }
 0x153   : > { %1123 = vmatpush.bf16.msrb.mxu0 %v2081_v47 }
 0x154   : > { %v749_v14 = vmax.f32 %v731_v7, 0.0 }
 0x156   : > { %v2462_v18 = vpack.c.bf16 %v749_v14, %v748_v16  ;;  %v2085_v16 = vld [vmem:[%s2729_s5 + $0xa0] sm:$0xff] }
 0x157   : > { %1124 = vmatpush.bf16.msrb.mxu0 %v2080_v52 }
 0x159   : > { %v733_v48 = vpop.f32.mrf.mxu3 }
 0x15a   : > { %v734_v5 = vadd.f32 %v2156_v57, %v733_v48  ;;  %v2071_v48 = vld [vmem:[%s2729_s5 + $0x40] sm:$0xff] }
 0x15c   : > { %v750_v13 = vmax.f32 %v734_v5, 0.0 }
 0x161   : > { %v735_v51 = vpop.f32.mrf.mxu3 }
 0x162   : > { %v736_v2 = vadd.f32 %v2156_v57, %v735_v51  ;;  %v2078_v51 = vld [vmem:[%s2729_s5 + $0x70] sm:$0xff] }
 0x164   : > { %v751_v8 = vmax.f32 %v736_v2, 0.0 }
 0x166   : > { %v2454_v15 = vpack.c.bf16 %v751_v8, %v750_v13  ;;  %v2086_v13 = vld [vmem:[%s2729_s5 + $0xa8] sm:$0xff] }
 0x169   : > { %v738_v54 = vpop.f32.mrf.mxu3 }
 0x16a   : > { %v739_v63 = vadd.f32 %v2156_v57, %v738_v54  ;;  %v2093_v54 = vld [vmem:[%s2729_s5 + $0xd8] sm:$0xff] }
 0x16b   : > { %1277 = vmatpush.bf16.msra.mxu0 %v2093_v54 }
 0x16c   : > { %v752_v6 = vmax.f32 %v739_v63, 0.0  ;;  %v2090_v63 = vld [vmem:[%s2729_s5 + $0xc0] sm:$0xff] }
 0x171   : > { %v740_v55 = vpop.f32.mrf.mxu3 }
 0x172   : > { %v741_v60 = vadd.f32 %v2156_v57, %v740_v55 }
 0x174   : > { %v753_v3 = vmax.f32 %v741_v60, 0.0 }
 0x176   : > { %v2448_v9 = vpack.c.bf16 %v753_v3, %v752_v6  ;;  %v2088_v6 = vld [vmem:[%s2729_s5 + $0xb8] sm:$0xff] }
 0x179   : > { %v743_v56 = vpop.f32.mrf.mxu3 }
 0x17a   : > { %v744_v58 = vadd.f32 %v2156_v57, %v743_v56  ;;  %v2077_v56 = vld [vmem:[%s2729_s5 + $0x68] sm:$0xff] }
 0x17c   : > { %v754_v0 = vmax.f32 %v744_v58, 0.0  ;;  %v2076_v58 = vld [vmem:[%s2729_s5 + $0x60] sm:$0xff] }
 0x181   : > { %v745_v59 = vpop.f32.mrf.mxu3 }
 0x182   : > { %v746_v61 = vadd.f32 %v2156_v57, %v745_v59  ;;  %v612_v62 = vpop.f32.mrf.mxu1  ;;  %v2092_v59 = vld [vmem:[%s2729_s5 + $0xd0] sm:$0xff] }
 0x183   : > { %1278 = vmatpush.bf16.msra.mxu0 %v2092_v59 }
 0x184   : > { %v755_v1 = vmax.f32 %v746_v61, 0.0 }
 0x186   : > { %v2443_v4 = vpack.c.bf16 %v755_v1, %v754_v0  ;;  %v2103_v1 = vld [vmem:[%s2729_s5 + $0x118] sm:$0xff] }
 0x188   : > { %774 = vmatpush.bf16.msrb.mxu1 %v2443_v4  ;;  %808 = vmatpush.bf16.msrb.mxu2 %v2443_v4 }
 0x189   : > { %1070 = vmatpush.bf16.msrb.mxu3 %v2443_v4 }
 0x18a   : > { %v614_v10 = vpop.f32.mrf.mxu1 }
 0x18b   : > { %v617_v11 = vpack.c.bf16 %v614_v10, %v612_v62  ;;  %v2091_v62 = vld [vmem:[%s2729_s5 + $0xc8] sm:$0xff]  ;;  %v2087_v10 = vld [vmem:[%s2729_s5 + $0xb0] sm:$0xff] }
 0x18c   : > { %775 = vmatpush.bf16.msrb.mxu1 %v2448_v9  ;;  %809 = vmatpush.bf16.msrb.mxu2 %v2448_v9 }
 0x18d   : > { %1071 = vmatpush.bf16.msrb.mxu3 %v2448_v9  ;;  %1723 = vmatmul.msk.bf16.vlgmr.msra.gmra.mxu2 %vm599_vm0, %v617_v11  ;;  %v2100_v11 = vld [vmem:[%s2729_s5 + $0x100] sm:$0xff] }
 0x18e   : > { %1279 = vmatpush.bf16.msra.mxu0 %v2091_v62 }
 0x190   : > { %776 = vmatpush.bf16.msrb.mxu1 %v2454_v15  ;;  %810 = vmatpush.bf16.msrb.mxu2 %v2454_v15 }
 0x191   : > { %1072 = vmatpush.bf16.msrb.mxu3 %v2454_v15 }
 0x192   : > { %1280 = vmatpush.bf16.msra.mxu0 %v2090_v63 }
 0x194   : > { %777 = vmatpush.bf16.msrb.mxu1 %v2462_v18  ;;  %811 = vmatpush.bf16.msrb.mxu2 %v2462_v18 }
 0x195   : > { %1073 = vmatpush.bf16.msrb.mxu3 %v2462_v18 }
 0x197   : > { %1748 = vmatmul.msk.bf16.vlgmr.msrb.gmra.mxu1 %vm599_vm0, %v2060_v19 }
 0x198   : > { %859 = vmatpush.bf16.msra.mxu1 %v2069_v17  ;;  %1862 = vmatmul.msk.bf16.vlgmr.msrb.gmra.mxu3 %vm599_vm0, %v2051_v45  ;;  %v2073_v45 = vld [vmem:[%s2729_s5 + $0x50] sm:$0xff] }
 0x199   : > { %1226 = vmatpush.bf16.msra.mxu3 %v2443_v4  ;;  %900 = vmatpush.bf16.msra.mxu2 %v2064_v24 }
 0x19c   : > { %860 = vmatpush.bf16.msra.mxu1 %v2068_v20  ;;  %v2097_v20 = vld [vmem:[%s2729_s5 + $0xf0] sm:$0xff] }
 0x19d   : > { %1227 = vmatpush.bf16.msra.mxu3 %v2448_v9  ;;  %1755 = vmatmul.msk.bf16.vlgmr.msrb.gmra.mxu2 %vm599_vm0, %v2065_v21 }
 0x19e   : > { %901 = vmatpush.bf16.msra.mxu2 %v2063_v25 }
 0x1a0   : > { %861 = vmatpush.bf16.msra.mxu1 %v2067_v22  ;;  %v2096_v22 = vld [vmem:[%s2729_s5 + $0xe8] sm:$0xff] }
 0x1a1   : > { %1228 = vmatpush.bf16.msra.mxu3 %v2454_v15 }
 0x1a2   : > { %902 = vmatpush.bf16.msra.mxu2 %v2062_v26 }
 0x1a4   : > { %862 = vmatpush.bf16.msra.mxu1 %v2066_v23  ;;  %v2095_v23 = vld [vmem:[%s2729_s5 + $0xe0] sm:$0xff] }
 0x1a5   : > { %1229 = vmatpush.bf16.msra.mxu3 %v2462_v18 }
 0x1a6   : > { %903 = vmatpush.bf16.msra.mxu2 %v2061_v27 }
 0x1a8   : > { %925 = vmatpush.bf16.msrb.mxu1 %v2443_v4  ;;  %1926 = vmatmul.msk.bf16.vlgmr.msra.gmra.mxu3 %vm599_vm0, %v2089_v36 }
 0x1a9   : > { %1382 = vmatpush.bf16.msrb.mxu3 %v2443_v4 }
 0x1aa   : > { %976 = vmatpush.bf16.msrb.mxu2 %v2074_v44 }
 0x1ac   : > { %926 = vmatpush.bf16.msrb.mxu1 %v2448_v9 }
 0x1ad   : > { %1383 = vmatpush.bf16.msrb.mxu3 %v2448_v9 }
 0x1ae   : > { %977 = vmatpush.bf16.msrb.mxu2 %v2073_v45 }
 0x1b0   : > { %927 = vmatpush.bf16.msrb.mxu1 %v2454_v15 }
 0x1b1   : > { %1384 = vmatpush.bf16.msrb.mxu3 %v2454_v15 }
 0x1b2   : > { %978 = vmatpush.bf16.msrb.mxu2 %v2072_v46 }
 0x1b4   : > { %928 = vmatpush.bf16.msrb.mxu1 %v2462_v18 }
 0x1b5   : > { %1385 = vmatpush.bf16.msrb.mxu3 %v2462_v18 }
 0x1b6   : > { %979 = vmatpush.bf16.msrb.mxu2 %v2071_v48 }
 0x1b8   : > { %1990 = vmatmul.msk.bf16.vlgmr.msrb.gmra.mxu3 %vm599_vm0, %v2099_v38  ;;  %v2107_v38 = vld [vmem:[%s2731_s7 + $0x18] sm:$0xff] }
 0x210   : > { %v2509_v28 = vpop.f32.mrf.mxu2 }
 0x214   : > { %v779_v29 = vpop.f32.mrf.mxu1 }
 0x218   : > { %v2511_v30 = vpop.f32.mrf.mxu2 }
 0x21b   : > { %v1075_v49 = vpop.f32.mrf.mxu3 }
 0x21c   : > { %v781_v31 = vpop.f32.mrf.mxu1 }
 0x21d   : > { %v784_v32 = vpack.c.bf16 %v781_v31, %v779_v29 }
 0x21f   : > { %1797 = vmatmul.msk.bf16.vlgmr.msra.gmra.mxu2 %vm599_vm0, %v784_v32 }
 0x220   : > { %v813_v33 = vpop.f32.mrf.mxu2  ;;  %1054 = vmatpush.bf16.msra.mxu2 %v2079_v50 }
 0x223   : > { %v1077_v55 = vpop.f32.mrf.mxu3 }
 0x224   : > { %1055 = vmatpush.bf16.msra.mxu2 %v2078_v51  ;;  %v1080_v57 = vpack.c.bf16 %v1077_v55, %v1075_v49 }
 0x226   : > { %1887 = vmatmul.msk.bf16.vlgmr.msrb.gmra.mxu0 %vm599_vm0, %v1080_v57 }
 0x227   : > { %1433 = vmatpush.bf16.msrb.mxu0 %v2103_v1 }
 0x228   : > { %v815_v34 = vpop.f32.mrf.mxu2  ;;  %1056 = vmatpush.bf16.msra.mxu2 %v2077_v56 }
 0x229   : > { %v818_v35 = vpack.c.bf16 %v815_v34, %v813_v33 }
 0x22b   : > { %1780 = vmatmul.msk.bf16.vlgmr.msra.gmra.mxu1 %vm599_vm0, %v818_v35  ;;  %v1231_v61 = vpop.f32.mrf.mxu3 }
 0x22c   : > { %1003 = vmatpush.bf16.msra.mxu1 %v2443_v4  ;;  %1057 = vmatpush.bf16.msra.mxu2 %v2076_v58 }
 0x230   : > { %1004 = vmatpush.bf16.msra.mxu1 %v2448_v9 }
 0x233   : > { %v1233_v2 = vpop.f32.mrf.mxu3 }
 0x234   : > { %1005 = vmatpush.bf16.msra.mxu1 %v2454_v15  ;;  %v1236_v3 = vpack.c.bf16 %v1233_v2, %v1231_v61 }
 0x236   : > { %1951 = vmatmul.msk.bf16.vlgmr.msra.gmra.mxu0 %vm599_vm0, %v1236_v3 }
 0x238   : > { %1006 = vmatpush.bf16.msra.mxu1 %v2462_v18 }
 0x23b   : > { %1804 = vmatmul.msk.bf16.vlgmr.msrb.gmra.mxu1 %vm599_vm0, %v2070_v37  ;;  %v1387_v8 = vpop.f32.mrf.mxu3 }
 0x23c   : > { %1148 = vmatpush.bf16.msrb.mxu1 %v2443_v4 }
 0x240   : > { %1149 = vmatpush.bf16.msrb.mxu1 %v2448_v9 }
 0x243   : > { %v1389_v14 = vpop.f32.mrf.mxu3 }
 0x244   : > { %1150 = vmatpush.bf16.msrb.mxu1 %v2454_v15 }
 0x248   : > { %1151 = vmatpush.bf16.msrb.mxu1 %v2462_v18 }
 0x24b   : > { %1836 = vmatmul.msk.bf16.vlgmr.msra.gmra.mxu1 %vm599_vm0, %v2075_v39  ;;  %v2106_v39 = vld [vmem:[%s2731_s7 + $0x10] sm:$0xff] }
 0x24c   : > { %1304 = vmatpush.bf16.msra.mxu1 %v2443_v4  ;;  %v2102_v4 = vld [vmem:[%s2729_s5 + $0x110] sm:$0xff] }
 0x24d   : > { %1434 = vmatpush.bf16.msrb.mxu0 %v2102_v4 }
 0x250   : > { %1305 = vmatpush.bf16.msra.mxu1 %v2448_v9  ;;  %v2101_v9 = vld [vmem:[%s2729_s5 + $0x108] sm:$0xff] }
 0x251   : > { %1435 = vmatpush.bf16.msrb.mxu0 %v2101_v9  ;;  %v2157_v9 = vld [vmem:[%s2734_s10] ss:$0 sm:$0xff] }
 0x254   : > { %1306 = vmatpush.bf16.msra.mxu1 %v2454_v15  ;;  %v1392_v15 = vpack.c.bf16 %v1389_v14, %v1387_v8 }
 0x255   : > { %1436 = vmatpush.bf16.msrb.mxu0 %v2100_v11 }
 0x258   : > { %1307 = vmatpush.bf16.msra.mxu1 %v2462_v18  ;;  %2015 = vmatmul.msk.bf16.vlgmr.msrb.gmra.mxu0 %vm599_vm0, %v1392_v15  ;;  %v2098_v18 = vld [vmem:[%s2729_s5 + $0xf8] sm:$0xff] }
 0x25b   : > { %1894 = vmatmul.msk.bf16.vlgmr.msrb.gmra.mxu1 %vm599_vm0, %v2084_v41  ;;  %v2105_v41 = vld [vmem:[%s2731_s7 + $0x8] sm:$0xff] }
 0x25c   : > { %1497 = vmatpush.bf16.msrb.mxu1 %v2107_v38 }
 0x260   : > { %1498 = vmatpush.bf16.msrb.mxu1 %v2106_v39 }
 0x264   : > { %1499 = vmatpush.bf16.msrb.mxu1 %v2105_v41 }
 0x268   : > { %1500 = vmatpush.bf16.msrb.mxu1 %v2104_v43 }
 0x26b   : > { %1958 = vmatmul.msk.bf16.vlgmr.msra.gmra.mxu1 %vm599_vm0, %v2094_v42 }
 0x2a2   : > { %v905_v31 = vpop.f32.mrf.mxu2 }
 0x2a3   : > { %v1126_v34 = vpop.f32.mrf.mxu0 }
 0x2a8   : > { %v2581_v53 = vpop.f32.mrf.mxu1 }
 0x2a9   : > { %v906_v45 = vadd.f32 %v905_v31, %v2581_v53  ;;  %v2158_v53 = vld [vmem:[%s2730_s6] ss:$0 sm:$0xff] }
 0x2aa   : > { %v907_v32 = vpop.f32.mrf.mxu2 }
 0x2ab   : > { %v1128_v37 = vpop.f32.mrf.mxu0 }
 0x2b0   : > { %v2596_v60 = vpop.f32.mrf.mxu1 }
 0x2b1   : > { %v908_v50 = vadd.f32 %v907_v32, %v2596_v60 }
 0x2b3   : > { %v1282_v42 = vpop.f32.mrf.mxu0 }
 0x2b8   : > { %v930_v0 = vpop.f32.mrf.mxu1 }
 0x2bb   : > { %v1284_v47 = vpop.f32.mrf.mxu0 }
 0x2c0   : > { %v932_v5 = vpop.f32.mrf.mxu1 }
 0x2c1   : > { %v935_v7 = vpack.c.bf16 %v932_v5, %v930_v0 }
 0x2c3   : > { %1829 = vmatmul.msk.bf16.vlgmr.msrb.gmra.mxu2 %vm599_vm0, %v935_v7 }
 0x2c4   : > { %1199 = vmatpush.bf16.msrb.mxu2 %v2088_v6 }
 0x2c8   : > { %v1008_v12 = vpop.f32.mrf.mxu1  ;;  %1200 = vmatpush.bf16.msrb.mxu2 %v2087_v10  ;;  %v2159_v10 = vld [vmem:[%s2732_s8] ss:$0 sm:$0xff] }
 0x2cc   : > { %1201 = vmatpush.bf16.msrb.mxu2 %v2086_v13 }
 0x2d0   : > { %v1010_v17 = vpop.f32.mrf.mxu1  ;;  %1202 = vmatpush.bf16.msrb.mxu2 %v2085_v16 }
 0x2d1   : > { %v1013_v19 = vpack.c.bf16 %v1010_v17, %v1008_v12  ;;  %v667_v12 = vadd.f32 %v2157_v9, %v2509_v28  ;;  %v669_v17 = vadd.f32 %v2157_v9, %v2511_v30 }
 0x2d3   : > { %1861 = vmatmul.msk.bf16.vlgmr.msra.gmra.mxu2 %vm599_vm0, %v1013_v19 }
 0x2d4   : > { %1355 = vmatpush.bf16.msra.mxu2 %v2098_v18 }
 0x2d5   : > { %v1438_v56 = vpop.f32.mrf.mxu0 }
 0x2d8   : > { %v1153_v21 = vpop.f32.mrf.mxu1  ;;  %1356 = vmatpush.bf16.msra.mxu2 %v2097_v20 }
 0x2dc   : > { %1357 = vmatpush.bf16.msra.mxu2 %v2096_v22 }
 0x2dd   : > { %v1440_v60 = vpop.f32.mrf.mxu0 }
 0x2e0   : > { %v1155_v24 = vpop.f32.mrf.mxu1  ;;  %1358 = vmatpush.bf16.msra.mxu2 %v2095_v23 }
 0x2e1   : > { %v1158_v25 = vpack.c.bf16 %v1155_v24, %v1153_v21 }
 0x2e3   : > { %1919 = vmatmul.msk.bf16.vlgmr.msrb.gmra.mxu2 %vm599_vm0, %v1158_v25 }
 0x2e8   : > { %v1309_v26 = vpop.f32.mrf.mxu1 }
 0x2f0   : > { %v1311_v27 = vpop.f32.mrf.mxu1 }
 0x2f1   : > { %v1314_v29 = vpack.c.bf16 %v1311_v27, %v1309_v26 }
 0x2f3   : > { %1983 = vmatmul.msk.bf16.vlgmr.msra.gmra.mxu2 %vm599_vm0, %v1314_v29 }
 0x346   : > { %v981_v33 = vpop.f32.mrf.mxu2 }
 0x347   : > { %v986_v46 = vadd.f32 %v981_v33, %v906_v45 }
 0x34e   : > { %v983_v35 = vpop.f32.mrf.mxu2 }
 0x34f   : > { %v987_v51 = vadd.f32 %v983_v35, %v908_v50 }
 0x356   : > { %v1059_v36 = vpop.f32.mrf.mxu2 }
 0x357   : > { %v1064_v48 = vadd.f32 %v1059_v36, %v986_v46 }
 0x359   : > { %v1131_v52 = vadd.f32 %v1126_v34, %v1064_v48 }
 0x35e   : > { %v1061_v40 = vpop.f32.mrf.mxu2 }
 0x35f   : > { %v1065_v54 = vadd.f32 %v1061_v40, %v987_v51 }
 0x361   : > { %v1132_v58 = vadd.f32 %v1128_v37, %v1065_v54 }
 0x366   : > { %v1204_v44 = vpop.f32.mrf.mxu2 }
 0x367   : > { %v1209_v55 = vadd.f32 %v1204_v44, %v1131_v52 }
 0x369   : > { %v1287_v59 = vadd.f32 %v1282_v42, %v1209_v55 }
 0x36e   : > { %v1206_v49 = vpop.f32.mrf.mxu2 }
 0x36f   : > { %v1210_v61 = vadd.f32 %v1206_v49, %v1132_v58 }
 0x371   : > { %v1288_v0 = vadd.f32 %v1284_v47, %v1210_v61 }
 0x376   : > { %v1360_v57 = vpop.f32.mrf.mxu2 }
 0x377   : > { %v1365_v62 = vadd.f32 %v1360_v57, %v1287_v59 }
 0x379   : > { %v1443_v63 = vadd.f32 %v1438_v56, %v1365_v62 }
 0x37b   : > { %v1449_v3 = vadd.f32 %v2158_v53, %v1443_v63 }
 0x37d   : > { %v1451_v6 = vmax.f32 %v1449_v3, 0.0 }
 0x37e   : > { %v1362_v1 = vpop.f32.mrf.mxu2 }
 0x37f   : > { %v1366_v2 = vadd.f32 %v1362_v1, %v1288_v0 }
 0x381   : > { %v1444_v4 = vadd.f32 %v1440_v60, %v1366_v2 }
 0x383   : > { %v1450_v5 = vadd.f32 %v2158_v53, %v1444_v4 }
 0x385   : > { %v1452_v7 = vmax.f32 %v1450_v5, 0.0 }
 0x387   : > { %v1453_v8 = vpack.c.bf16 %v1452_v7, %v1451_v6 }
 0x389   : > { %2032 = vmatmul.msk.bf16.vlgmr.msrb.gmra.mxu1 %vm599_vm0, %v1453_v8 }
 0x406   : > { %v1502_v11 = vpop.f32.mrf.mxu1 }
 0x407   : > { %v1503_v13 = vadd.f32 %v2159_v10, %v1502_v11 }
 0x409   : > { %v1507_v14 = vadd.f32 %v1503_v13, %v667_v12 }
 0x40b   : > { %v1509_v15 = vmax.f32 %v1507_v14, 0.0 }
 0x40d   : > { %1511 = vst [vmem:[%s437_s15] sm:$0xff] %v1509_v15 }
 0x40e   : > { %v1504_v16 = vpop.f32.mrf.mxu1 }
 0x40f   : > { %v1505_v18 = vadd.f32 %v2159_v10, %v1504_v16 }
 0x411   : > { %v1508_v28 = vadd.f32 %v1505_v18, %v669_v17 }
 0x413   : > { %v1510_v19 = vmax.f32 %v1508_v28, 0.0 }
 0x415   : > { %1512 = vst [vmem:[%s437_s15 + $0x8] sm:$0xff] %v1510_v19  ;;  %v1513_v20 = vadd.f32 %v1510_v19, %v1509_v15 }
 0x416   : > { %2187 = shalt.err (!%p2184_p3)
}
 0x417   : > { %s2256_s15 = smov 128   ;;  %s2257_s1 = smov 8   ;;  %v1514_v30 = vrot.slane %v1513_v20, 4 }
 0x418   : > { %2109 = dma.vmem_to_hbm [thread:$0]  (%p2366_p5), %s1540_s21, 256, %s1542_s17, %s1523_s22, %s2256_s15, %s2256_s15, %s2257_s1  }
 0x419   : > { %v1515_v21 = vadd.f32 %v1514_v30, %v1513_v20  ;;  %s1553_s0 = scalar_lea.hbm %s2737_s13, %s2349_s29  ;;  %s443_s23 = scalar_lea.vmem [#allocation4], %s2671_s24 }
 0x41a   : > { %s1555_s27 = sshll.u32 %s443_s23, 4  ;;  %s1557_s14 = sshll.u32 %s1553_s0, 4  ;;  %s1556_s27 = int_to_ptr.vmem [resolvable:$true] %s1555_s27  ;;  %s1558_s14 = int_to_ptr.hbm [resolvable:$true] %s1557_s14 }
 0x41b   : > { %v1516_v22 = vrot.slane %v1515_v21, 2  ;;  %s1528_s20 = scalar_lea.sflag [#allocation5], %s2671_s24  ;;  %s2202_s1 = sshra.s32 %s1558_s14, 4  ;;  %s2203_s1 = int_to_ptr.hbm [resolvable:$true] %s2202_s1 }
 0x41c   : > { %s2204_s21 = scalar_lea.hbm %s2203_s1, 1  ;;  %s2208_s29 = scalar_lea.hbm %s2737_s13, 2 }
 0x41d   : > { %v1517_v23 = vadd.f32 %v1516_v22, %v1515_v21  ;;  %p2205_p4 = scmp.ne.s32.totalorder %s2203_s1, %s2204_s21  ;;  %p2209_p9 = scmp.lt.s32.totalorder %s2203_s1, %s2737_s13 }
 0x41e   : > { %p2210_p10 = scmp.lt.s32.totalorder %s2208_s29, %s2204_s21 }
 0x41f   : > { %v1518_v24 = vrot.slane %v1517_v23, 1  ;;  %p2206_p7 = pnand %p2205_p4, %p2366_p5 }
 0x420   : > { %p2211_p11 = por %p2210_p10, %p2209_p9 }
 0x421   : > { %v1519_v25 = vadd.f32 %v1518_v24, %v1517_v23  ;;  %p2207_p8 = pneg %p2206_p7 }
 0x423   : > { %v1520_v26 = vmul.f32 0.0625, %v1519_v25  ;;  %p2212_p12 = pnand %p2211_p11, %p2207_p8 }
 0x425   : > { %1521 = vst [vmem:[%s443_s23] sm:$0x1] %v1520_v26 }
 0x426   : > { %2215 = shalt.err (!%p2212_p12)
}
 0x427   : > { %2110 = dma.vmem_to_hbm [thread:$0]  (%p2366_p5), %s1556_s27, 16, %s1558_s14, %s1528_s20  }
 0x428 PF: > { %p2120_p13 = scmp.ge.s32.totalorder %s2254_s28, 2  ;;  %s1569_s24 = sand.u32 1, %s2242_s25  }
 0x429   : > { %s1570_s16 = scalar_lea.sflag [#allocation3], %s1569_s24 }
 0x42a   : > { %p2114_p0 = pnand %p2120_p13, %p2370_p6 }
 0x42c   : > { %p2115_p1 = pneg %p2114_p0 }
 0x42e   : > { %2233 = dma.done.wait (%p2115_p1), %s1570_s16, 256  }
 0x42f   : > { %2235 = vsyncadd (%p2115_p1), %s1570_s16, 4294967040  ;;  %s1580_s0 = scalar_lea.sflag [#allocation5], %s1569_s24 }
 0x430   : > { %2237 = dma.done.wait (%p2115_p1), %s1580_s0, 16  }
 0x431   : > { %2239 = vsyncadd (%p2115_p1), %s1580_s0, 4294967280  ;;  %s2750_s28 = sld [smem:[#allocation9_spill]]  ;;  %s2753_s25 = smov %s2246_s26 }
 0x432   : > { %s2751_s23 = sld [smem:[#allocation8_spill]] }
 0x433   : > { %s2752_s27 = sld [smem:[#allocation10_spill]] }
 0x437   : > { %p27_p5 = scmp.ge.s32.totalorder %s2750_s28, 4  }
 0x438   : > { %s2754_s26 = smov %s2751_s23 }
 0x439   :  { %29 = sbr.rel (!%p27_p5) target bundleno = 8 (0x8), region = 136 }
 0x43e   :  { %1585 = vsyncpa [#allocation3], 1 }
 0x43f   :  { %1587 = vsyncpa [#allocation3 + $0x1], 1 }
 0x440   :  { %1588 = vsyncpa [#allocation5], 1 }
 0x441   :  { %1590 = vsyncpa [#allocation5 + $0x1], 1 }

</bundles_post_ra>
